<compile_context>
chip_gen: v6e
topology: v6e:2x2x1
jax: 0.10.0
libtpu: 0.0.40
codegen_flags: <defaults>
</compile_context>

<pallas_src>
import functools

import jax
import jax.numpy as jnp
from jax.experimental import pallas as pl
from jax.experimental.pallas import tpu as pltpu


SUBLANE = 8  # f32/row padding granularity (second-to-last block dim)


def _round_up(v: int, m: int) -> int:
    return ((v + m - 1) // m) * m


def _fused_mlp_kernel(*refs, n_layers: int):
    """Fused MLP forward on one row-tile.

    refs layout: (x_ref, w_0..w_{L-1}, b_0..b_{L-1}, o_ref)
      x_ref : (tm, d_in)   bf16 activations
      w_j   : (d_j, d_{j+1}) bf16 weights (natural, unpadded shapes)
      b_j   : (1, d_{j+1})   f32 biases
      o_ref : (tm, d_out)  f32 output
    """
    x_ref = refs[0]
    w_refs = refs[1:1 + n_layers]
    b_refs = refs[1 + n_layers:1 + 2 * n_layers]
    o_ref = refs[1 + 2 * n_layers]

    h = x_ref[...]  # bf16
    for j in range(n_layers):  # static unroll
        acc = jnp.dot(h, w_refs[j][...], preferred_element_type=jnp.float32)
        acc = acc + b_refs[j][...]            # f32 bias broadcast (1, d_out_j)
        if j != n_layers - 1:
            acc = jnp.maximum(acc, 0.0)       # ReLU in f32
            h = acc.astype(jnp.bfloat16)      # back to bf16 for the next MXU pass
        else:
            h = acc
    o_ref[...] = h.astype(o_ref.dtype)


def _fused_mlp_small(x, weights, biases, *, n_layers: int, d_out: int):
    """Single invocation, no grid / pipeline machinery (tiny batches)."""
    n_pad = x.shape[0]
    n_in = 1 + 2 * n_layers
    kernel = functools.partial(_fused_mlp_kernel, n_layers=n_layers)
    return pl.pallas_call(
        kernel,
        out_shape=jax.ShapeDtypeStruct((n_pad, d_out), jnp.float32),
        in_specs=[pl.BlockSpec(memory_space=pltpu.MemorySpace.VMEM)] * n_in,
        out_specs=pl.BlockSpec(memory_space=pltpu.MemorySpace.VMEM),
        compiler_params=pltpu.CompilerParams(
            vmem_limit_bytes=32 * 1024 * 1024,
        ),
    )(x, *weights, *biases)


def _fused_mlp_tiled(x, weights, biases, *, n_layers: int, d_out: int, tm: int):
    """Row-tiled invocation for large batches (row axis is 'parallel')."""
    n_pad, d_in = x.shape
    grid = (pl.cdiv(n_pad, tm),)

    in_specs = [pl.BlockSpec((tm, d_in), lambda i: (i, 0))]  # (tm, 32) -- natural lanes
    # Weights / biases stay resident across all row tiles (constant index_map).
    for w in weights:
        in_specs.append(pl.BlockSpec(w.shape, lambda i: (0, 0)))
    for b in biases:
        in_specs.append(pl.BlockSpec(b.shape, lambda i: (0, 0)))

    kernel = functools.partial(_fused_mlp_kernel, n_layers=n_layers)
    return pl.pallas_call(
        kernel,
        out_shape=jax.ShapeDtypeStruct((n_pad, d_out), jnp.float32),
        grid=grid,
        in_specs=in_specs,
        out_specs=pl.BlockSpec((tm, d_out), lambda i: (i, 0)),  # (tm, 16)
        compiler_params=pltpu.CompilerParams(
            dimension_semantics=("parallel",),   # v7x: shard row tiles across both TCs
            vmem_limit_bytes=32 * 1024 * 1024,   # safe on v5e / v6e / v7x
        ),
    )(x, *weights, *biases)


class DenseNetPallas:
    """JAX/Pallas port of the PyTorch DenseNet (MLP with ReLU nonlinearity)."""

    # Below this (padded) batch size use the gridless single-shot kernel.
    _SMALL_BATCH = 256

    def __init__(self, layers, key, normalize=False, out_nonlinearity=False):
        # normalize=False, out_nonlinearity=None for this instance.
        # TODO(synk): BatchNorm1d (normalize=True) path not implemented here.
        assert not normalize and not out_nonlinearity
        self.n_layers = len(layers) - 1
        assert self.n_layers >= 1
        self.layers = list(layers)
        self.d_in = layers[0]
        self.d_out = layers[-1]

        # Per-layer params. Weights pre-transposed to (in, out) so y = x @ W + b.
        # f32 masters kept for the reference; kernel consumes bf16 weights and
        # f32 biases at their natural (unpadded) shapes.
        self.params = []
        self.w_bf16 = []
        self.b_f32 = []
        for j in range(self.n_layers):
            di, do = layers[j], layers[j + 1]
            key, kw, kb = jax.random.split(key, 3)
            bound = 1.0 / (di ** 0.5)  # nn.Linear default init bounds
            w = jax.random.uniform(kw, (di, do), jnp.float32, -bound, bound)
            b = jax.random.uniform(kb, (do,), jnp.float32, -bound, bound)
            self.params.append((w, b))
            self.w_bf16.append(w.astype(jnp.bfloat16))
            self.b_f32.append(b.reshape(1, do))

    def __call__(self, x):
        n, di = x.shape
        assert di == self.d_in

        # Pad rows only to the 8-row sublane (NOT to the tile size).
        n_pad = _round_up(max(n, SUBLANE), SUBLANE)
        x_p = x.astype(jnp.bfloat16)
        if n_pad != n:
            x_p = jnp.pad(x_p, ((0, n_pad - n), (0, 0)))

        if n_pad <= self._SMALL_BATCH:
            y = _fused_mlp_small(x_p, self.w_bf16, self.b_f32,
                                 n_layers=self.n_layers, d_out=self.d_out)
        else:
            # Big tiles amortize the ~0.35us/step overhead; cap at ~n_pad//2 so
            # v7x's two TensorCores both get at least one grid step.
            tm = max(256, min(1024, _round_up(max(n_pad // 2, SUBLANE), SUBLANE)))
            y = _fused_mlp_tiled(x_p, self.w_bf16, self.b_f32,
                                 n_layers=self.n_layers, d_out=self.d_out, tm=tm)

        return y[:n]

    def reference(self, x):
        """Pure-JAX f32 reference forward (unquantized params)."""
        h = x
        for j, (w, b) in enumerate(self.params):
            h = h @ w + b
            if j != self.n_layers - 1:
                h = jnp.maximum(h, 0.0)
        return h


if __name__ == "__main__":
    key = jax.random.PRNGKey(0)
    key, kx, kx2, kp = jax.random.split(key, 4)

    # DenseNet(layers=[32, 64, 64, 16], nonlinearity=nn.ReLU)
    layers = [32, 64, 64, 16]
    net = DenseNetPallas(layers, kp)

    # Tolerances are loose because the kernel uses bf16 weights/activations
    # (f32 accumulation) while the reference is pure f32.
    ATOL = RTOL = 5e-2

    # 1) Small batch -> fused gridless kernel.
    batch = 8
    x = jax.random.normal(kx, (batch, layers[0]), jnp.float32)
    y = jax.block_until_ready(net(x))
    ref = net.reference(x)
    assert y.shape == (batch, layers[-1])
    assert jnp.allclose(y, ref, atol=ATOL, rtol=RTOL)

    # 2) Larger, non-tile-multiple batch -> row-tiled ("parallel") kernel path
    #    with a partial last block (exercises pl.cdiv grid + masked boundary).
    batch2 = 600
    x2 = jax.random.normal(kx2, (batch2, layers[0]), jnp.float32)
    y2 = jax.block_until_ready(net(x2))
    ref2 = net.reference(x2)
    assert y2.shape == (batch2, layers[-1])
    assert jnp.allclose(y2, ref2, atol=ATOL, rtol=RTOL)

    print("KERNEL_OK")
</pallas_src>

<mosaic_0001>
module attributes {stable_mosaic.version = 11 : i64} {
  func.func @_fused_mlp_kernel(%arg0: memref<8x32xbf16, #tpu.memory_space<vmem>>, %arg1: memref<32x64xbf16, #tpu.memory_space<vmem>>, %arg2: memref<64x64xbf16, #tpu.memory_space<vmem>>, %arg3: memref<64x16xbf16, #tpu.memory_space<vmem>>, %arg4: memref<1x64xf32, #tpu.memory_space<vmem>>, %arg5: memref<1x64xf32, #tpu.memory_space<vmem>>, %arg6: memref<1x16xf32, #tpu.memory_space<vmem>>, %arg7: memref<8x16xf32, #tpu.memory_space<vmem>>) attributes {dimension_semantics = [], scalar_prefetch = 0 : i64, scratch_operands = 0 : i64, tpu.core_type = #tpu.core_type<tc>} {
    %c0 = arith.constant 0 : index
    %c0_0 = arith.constant 0 : index
    %0 = vector.load %arg0[%c0, %c0_0] : memref<8x32xbf16, #tpu.memory_space<vmem>>, vector<8x32xbf16>
    %c0_1 = arith.constant 0 : index
    %c0_2 = arith.constant 0 : index
    %1 = vector.load %arg1[%c0_1, %c0_2] : memref<32x64xbf16, #tpu.memory_space<vmem>>, vector<32x64xbf16>
    %cst = arith.constant dense<0.000000e+00> : vector<8x64xf32>
    %2 = tpu.matmul %0, %1, %cst {dimension_numbers = #tpu.dot_dimension_numbers<[1], [0], [0], [1], [0, 0, 1, 1], [], []>} : vector<8x32xbf16>, vector<32x64xbf16>, vector<8x64xf32> -> vector<8x64xf32>
    %c0_3 = arith.constant 0 : index
    %c0_4 = arith.constant 0 : index
    %3 = vector.load %arg4[%c0_3, %c0_4] : memref<1x64xf32, #tpu.memory_space<vmem>>, vector<1x64xf32>
    %4 = vector.broadcast %3 : vector<1x64xf32> to vector<8x64xf32>
    %5 = arith.addf %2, %4 : vector<8x64xf32>
    %cst_5 = arith.constant 0.000000e+00 : f32
    %6 = vector.broadcast %cst_5 : f32 to vector<8x64xf32>
    %7 = arith.maximumf %5, %6 : vector<8x64xf32>
    %8 = arith.truncf %7 : vector<8x64xf32> to vector<8x64xbf16>
    %c0_6 = arith.constant 0 : index
    %c0_7 = arith.constant 0 : index
    %9 = vector.load %arg2[%c0_6, %c0_7] : memref<64x64xbf16, #tpu.memory_space<vmem>>, vector<64x64xbf16>
    %cst_8 = arith.constant dense<0.000000e+00> : vector<8x64xf32>
    %10 = tpu.matmul %8, %9, %cst_8 {dimension_numbers = #tpu.dot_dimension_numbers<[1], [0], [0], [1], [0, 0, 1, 1], [], []>} : vector<8x64xbf16>, vector<64x64xbf16>, vector<8x64xf32> -> vector<8x64xf32>
    %c0_9 = arith.constant 0 : index
    %c0_10 = arith.constant 0 : index
    %11 = vector.load %arg5[%c0_9, %c0_10] : memref<1x64xf32, #tpu.memory_space<vmem>>, vector<1x64xf32>
    %12 = vector.broadcast %11 : vector<1x64xf32> to vector<8x64xf32>
    %13 = arith.addf %10, %12 : vector<8x64xf32>
    %cst_11 = arith.constant 0.000000e+00 : f32
    %14 = vector.broadcast %cst_11 : f32 to vector<8x64xf32>
    %15 = arith.maximumf %13, %14 : vector<8x64xf32>
    %16 = arith.truncf %15 : vector<8x64xf32> to vector<8x64xbf16>
    %c0_12 = arith.constant 0 : index
    %c0_13 = arith.constant 0 : index
    %17 = vector.load %arg3[%c0_12, %c0_13] : memref<64x16xbf16, #tpu.memory_space<vmem>>, vector<64x16xbf16>
    %cst_14 = arith.constant dense<0.000000e+00> : vector<8x16xf32>
    %18 = tpu.matmul %16, %17, %cst_14 {dimension_numbers = #tpu.dot_dimension_numbers<[1], [0], [0], [1], [0, 0, 1, 1], [], []>} : vector<8x64xbf16>, vector<64x16xbf16>, vector<8x16xf32> -> vector<8x16xf32>
    %c0_15 = arith.constant 0 : index
    %c0_16 = arith.constant 0 : index
    %19 = vector.load %arg6[%c0_15, %c0_16] : memref<1x16xf32, #tpu.memory_space<vmem>>, vector<1x16xf32>
    %20 = vector.broadcast %19 : vector<1x16xf32> to vector<8x16xf32>
    %21 = arith.addf %18, %20 : vector<8x16xf32>
    %c0_17 = arith.constant 0 : index
    %c0_18 = arith.constant 0 : index
    %22 = vector.load %arg7[%c0_17, %c0_18] : memref<8x16xf32, #tpu.memory_space<vmem>>, vector<8x16xf32>
    tpu.vector_store %arg7[%c0_17, %c0_18], %21 {strides = array<i32>} : memref<8x16xf32, #tpu.memory_space<vmem>>, vector<8x16xf32>,
    return
  }
}

</mosaic_0001>

<bundles_post_ra>
// kernel: tpu_custom_call.1
= control target key start
LH: loop header
LB: loop body
LE: loop exit
PB: predicated region body
PF: predicated region fallthrough
CT: control target
= control target key end

     0   :  { %12 = vsyncpa [#allocation3], 0  ;;  %s510_s0 = inlined_call_operand.vmem [shape: bf16[8,32], index: 0, kind: input, shape index: {}]   ;;  %s511_s1 = inlined_call_operand.hbm [shape: bf16[32,64], index: 1, kind: input, shape index: {}]   ;;  %s512_s2 = inlined_call_operand.vmem [shape: bf16[64,64], index: 2, kind: input, shape index: {}]   ;;  %s513_s3 = inlined_call_operand.vmem [shape: bf16[64,16], index: 3, kind: input, shape index: {}]   ;;  %s514_s4 = inlined_call_operand.vmem [shape: f32[1,64], index: 4, kind: input, shape index: {}]   ;;  %s515_s5 = inlined_call_operand.vmem [shape: f32[1,64], index: 5, kind: input, shape index: {}]   ;;  %s516_s6 = inlined_call_operand.vmem [shape: f32[1,16], index: 6, kind: input, shape index: {}]   ;;  %s517_s7 = inlined_call_operand.hbm [shape: f32[8,16], index: 7, kind: output, shape index: {}]  }
   0x1   :  { %13 = vsyncpa [#allocation4], 0  ;;  %s417_s24 = smov [#allocation2]  }
   0x2   :  { %s21_s25 = sshll.u32 %s417_s24, 4  ;;  %s22_s25 = int_to_ptr.vmem [resolvable:$true] %s21_s25 }
   0x3   :  { %s381_s26 = scalar_lea.vmem %s22_s25, 256  ;;  %p386_p1 = scmp.lt.s32.totalorder %s22_s25, %s22_s25 }
   0x4   :  { %p382_p0 = scmp.ne.s32.totalorder %s22_s25, %s381_s26  ;;  %p387_p2 = scmp.lt.s32.totalorder %s381_s26, %s381_s26 }
   0x6   :  { %p388_p3 = por %p387_p2, %p386_p1 }
   0x8   :  { %p389_p4 = pnand %p388_p3, %p382_p0 }
   0xa   :  { %392 = shalt.err (!%p389_p4)
}
   0xb   :  { %s418_s27 = smov 64   ;;  %s419_s28 = smov 4  }
   0xc   :  { %27 = dma.hbm_to_vmem [thread:$0]  %s511_s1, 256, %s22_s25, [#allocation3], %s418_s27, %s418_s27, %s419_s28  }
   0xd   :  { %413 = dma.done.wait [#allocation3], 256  }
   0xe   :  { %414 = vsyncadd [#allocation3], 4294967040  ;;  %v420_v0 = vmov 0.0   ;;  %vm421_vm0 = vmmov 0   ;;  %v363_v1 = vld [vmem:[#allocation2 + $0x8] sm:$0xff]   ;;  %v364_v2 = vld [vmem:[#allocation2] sm:$0xff]  }
   0xf   :  { %325 = vmatprep.subr.bf16.mxu0 %v420_v0  ;;  %329 = vmatprep.mubr.msk.bf16.mxu0 %vm421_vm0, %v420_v0  ;;  %v365_v3 = vld [vmem:[%s512_s2 + $0x18] sm:$0xff]   ;;  %v42_v4 = vld [vmem:[%s510_s0] sm:$0xf]  ;;  %vm66_vm1 = vcmask 261120   ;;  %v366_v5 = vld [vmem:[%s512_s2 + $0x10] sm:$0xff]   ;;  %vm151_vm2 = vcmask 523264  }
  0x10   :  { %333 = vmatprep.subr.bf16.mxu1 %v420_v0  ;;  %341 = vmatprep.mubr.msk.bf16.mxu1 %vm421_vm0, %v420_v0  ;;  %v367_v6 = vld [vmem:[%s512_s2 + $0x8] sm:$0xff]   ;;  %v368_v7 = vld [vmem:[%s512_s2] sm:$0xff]   ;;  %v369_v8 = vld [vmem:[%s513_s3 + $0x18] sm:$0xff]   ;;  %s422_s28 = smov [#allocation5]   ;;  %vm279_vm3 = vcmask 130048  }
  0x11   :  { %326 = vmatpush3.bf16.msra.mxu0 %v363_v1  ;;  %334 = vmatpush3.bf16.msra.mxu1 %v365_v3  ;;  %v370_v9 = vld [vmem:[%s513_s3 + $0x10] sm:$0xff]   ;;  %v296_v10 = vld [vmem:[%s514_s4] ss:$0 sm:$0xff]  ;;  %v371_v18 = vld [vmem:[%s513_s3 + $0x8] sm:$0xff]  }
  0x12   :  { %327 = vmatprep.subr.bf16.mxu0 %v420_v0  ;;  %335 = vmatprep.subr.bf16.mxu1 %v420_v0  ;;  %v372_v19 = vld [vmem:[%s513_s3] sm:$0xff]   ;;  %s287_s3 = sshll.u32 %s422_s28, 4  ;;  %s288_s3 = int_to_ptr.vmem [resolvable:$true] %s287_s3 }
  0x13   :  { %v300_v20 = vld [vmem:[%s515_s5] ss:$0 sm:$0xff]  ;;  %s393_s5 = scalar_lea.vmem %s288_s3, 128  ;;  %p398_p6 = scmp.lt.s32.totalorder %s288_s3, %s288_s3 }
  0x14   :  { %v306_v28 = vld [vmem:[%s516_s6] ss:$0 sm:$0xff]  ;;  %p394_p5 = scmp.ne.s32.totalorder %s288_s3, %s393_s5  ;;  %p399_p7 = scmp.lt.s32.totalorder %s393_s5, %s393_s5 }
  0x15   :  { %328 = vmatpush3.bf16.msra.mxu0 %v364_v2  ;;  %336 = vmatpush3.bf16.msra.mxu1 %v366_v5 }
  0x16   :  { %345 = vmatprep.subr.bf16.mxu0 %v420_v0  ;;  %337 = vmatprep.subr.bf16.mxu1 %v420_v0  ;;  %p400_p8 = por %p399_p7, %p398_p6 }
  0x18   :  { %330 = vmatmul.mubr.msk.bf16.vlgmr.msra.gmra.mxu0 %vm66_vm1, %v42_v4  ;;  %p401_p9 = pnand %p400_p8, %p394_p5 }
  0x19   :  { %353 = vmatprep.mubr.msk.bf16.mxu0 %vm421_vm0, %v420_v0  ;;  %338 = vmatpush3.bf16.msra.mxu1 %v367_v6 }
  0x1a   :  { %339 = vmatprep.subr.bf16.mxu1 %v420_v0  ;;  %346 = vmatpush3.bf16.msra.mxu0 %v369_v8 }
  0x1b   :  { %347 = vmatprep.subr.bf16.mxu0 %v420_v0 }
  0x1d   :  { %340 = vmatpush3.bf16.msra.mxu1 %v368_v7 }
  0x1e   :  { %348 = vmatpush3.bf16.msra.mxu0 %v370_v9 }
  0x1f   :  { %349 = vmatprep.subr.bf16.mxu0 %v420_v0 }
  0x22   :  { %350 = vmatpush3.bf16.msra.mxu0 %v371_v18 }
  0x23   :  { %351 = vmatprep.subr.bf16.mxu0 %v420_v0 }
  0x26   :  { %352 = vmatpush3.bf16.msra.mxu0 %v372_v19 }
  0xd8   :  { %v104_v11 = vpop.f32.mrf.mxu0 }
  0xd9   :  { %v105_v12 = vadd.f32 %v296_v10, %v104_v11 }
  0xda   :  { %v331_v13 = vpop.f32.mrf.mxu0 }
  0xdb   :  { %v110_v14 = vmax.f32 %v105_v12, 0.0 }
  0xdc   :  { %v107_v15 = vpop.f32.mrf.mxu0 }
  0xdd   :  { %v111_v16 = vpack.c.bf16 %v110_v14, %v110_v14 }
  0xde   :  { %v332_v17 = vpop.f32.mrf.mxu0 }
  0xdf   :  { %342 = vmatmul.mubr.msk.bf16.vlgmr.msra.gmra.mxu1 %vm151_vm2, %v111_v16 }
 0x19f   :  { %v189_v21 = vpop.f32.mrf.mxu1 }
 0x1a0   :  { %v190_v22 = vadd.f32 %v300_v20, %v189_v21 }
 0x1a1   :  { %v343_v23 = vpop.f32.mrf.mxu1 }
 0x1a2   :  { %v195_v24 = vmax.f32 %v190_v22, 0.0 }
 0x1a3   :  { %v192_v25 = vpop.f32.mrf.mxu1 }
 0x1a4   :  { %v196_v26 = vpack.c.bf16 %v195_v24, %v195_v24 }
 0x1a5   :  { %v344_v27 = vpop.f32.mrf.mxu1 }
 0x1a6   :  { %354 = vmatmul.mubr.msk.bf16.vlgmr.msra.gmra.mxu0 %vm151_vm2, %v196_v26 }
 0x266   :  { %v273_v29 = vpop.f32.mrf.mxu0 }
 0x267   :  { %v274_v30 = vadd.f32 %v306_v28, %v273_v29 }
 0x268   :  { %v355_v31 = vpop.f32.mrf.mxu0 }
 0x269   :  { %280 = vst.msk [vmem:[#allocation5] sm:$0xff] %vm279_vm3, %v274_v30 }
 0x26a   :  { %v276_v32 = vpop.f32.mrf.mxu0 }
 0x26b   :  { %404 = shalt.err (!%p401_p9)
}
 0x26c   :  { %290 = dma.vmem_to_hbm [thread:$0]  %s288_s3, 128, %s517_s7, [#allocation4]   ;;  %v356_v33 = vpop.f32.mrf.mxu0 }
 0x26d   :  { %415 = dma.done.wait [#allocation4], 128  }
 0x26e   :  { %416 = vsyncadd [#allocation4], 4294967168 }
 0x26f   :  { %294 = vsyncpa [#allocation3], 1 }
 0x270   :  { %295 = vsyncpa [#allocation4], 1 }

</bundles_post_ra>
